<compile_context>
chip_gen: v5e
topology: v5e:2x2
jax: 0.10.0
libtpu: 0.0.40
codegen_flags: <defaults>
</compile_context>

<pallas_src>
import math

import jax
import jax.numpy as jnp
from jax.experimental import pallas as pl
from jax.experimental.pallas import tpu as pltpu


def _copy_kernel(x_ref, o_ref):
    # Pure identity copy of one lane-dense (row_tile, lane_tile) tile.
    o_ref[...] = x_ref[...]


def _pick_lane_tile(flat: int) -> int:
    """Largest 128-multiple tile (<= 2048 lanes) that divides `flat`."""
    for cand in (2048, 1024, 512, 256, 128):
        if flat % cand == 0:
            return cand
    # Full-extent block is always legal even if not a multiple of 128.
    return flat


def _pick_row_tile(b: int, lane_tile: int, itemsize: int,
                   budget_bytes: int = 2 * 1024 * 1024) -> int:
    """Largest multiple-of-8 row tile dividing `b` that keeps the block <= ~2 MiB."""
    for cand in (512, 256, 128, 64, 32, 16, 8):
        if b % cand == 0 and cand * lane_tile * itemsize <= budget_bytes:
            return cand
    # Fall back to the full batch dim (legal: block dim == array dim).
    return b


@jax.jit
def flatten(x: jax.Array) -> jax.Array:
    """Pallas equivalent of torch `x.view(x.size(0), -1)`."""
    b = x.shape[0]
    flat = math.prod(x.shape[1:])
    itemsize = jnp.dtype(x.dtype).itemsize

    # Metadata-only under jit: collapsing trailing contiguous dims is a bitcast,
    # so the kernel sees a lane-dense (B, C*H*W) input with no extra HBM traffic.
    x2 = x.reshape(b, flat)

    lane_tile = _pick_lane_tile(flat)
    row_tile = _pick_row_tile(b, lane_tile, itemsize)
    grid = (b // row_tile, flat // lane_tile)

    return pl.pallas_call(
        _copy_kernel,
        out_shape=jax.ShapeDtypeStruct((b, flat), x.dtype),
        grid=grid,
        in_specs=[pl.BlockSpec((row_tile, lane_tile), lambda i, j: (i, j))],
        out_specs=pl.BlockSpec((row_tile, lane_tile), lambda i, j: (i, j)),
        compiler_params=pltpu.CompilerParams(
            dimension_semantics=("parallel", "parallel"),
            vmem_limit_bytes=32 * 1024 * 1024,
        ),
        cost_estimate=pl.CostEstimate(
            flops=0,
            transcendentals=0,
            bytes_accessed=2 * b * flat * itemsize,
        ),
    )(x2)


if __name__ == "__main__":
    key = jax.random.PRNGKey(0)
    # Small NCHW input consistent with the module's forward: (B, C, H, W)
    x = jax.random.normal(key, (2, 4, 16, 16), dtype=jnp.float32)

    out = flatten(x)
    out = jax.block_until_ready(out)

    # Reference: plain JAX row-major flatten (== torch .view(B, -1))
    ref = x.reshape(x.shape[0], -1)

    assert out.shape == (2, 4 * 16 * 16), out.shape
    assert out.dtype == x.dtype
    assert bool(jnp.array_equal(out, ref)), "Pallas flatten mismatch vs reference"

    print("KERNEL_OK")
</pallas_src>

<mosaic_0001>
module attributes {stable_mosaic.version = 11 : i64} {
  func.func @_copy_kernel(%arg0: i32, %arg1: i32, %arg2: memref<2x1024xf32, #tpu.memory_space<vmem>>, %arg3: memref<2x1024xf32, #tpu.memory_space<vmem>>) attributes {dimension_semantics = [#tpu.dimension_semantics<parallel>, #tpu.dimension_semantics<parallel>], iteration_bounds = array<i64: 1, 1>, scalar_prefetch = 0 : i64, scratch_operands = 0 : i64, tpu.core_type = #tpu.core_type<tc>, window_params = [{transform_indices = @transform_0, window_bounds = array<i64: 2, 1024>}, {transform_indices = @transform_1, window_bounds = array<i64: 2, 1024>}]} {
    %c0 = arith.constant 0 : index
    %c0_0 = arith.constant 0 : index
    %0 = vector.load %arg2[%c0, %c0_0] : memref<2x1024xf32, #tpu.memory_space<vmem>>, vector<2x1024xf32>
    %c0_1 = arith.constant 0 : index
    %c0_2 = arith.constant 0 : index
    %1 = vector.load %arg3[%c0_1, %c0_2] : memref<2x1024xf32, #tpu.memory_space<vmem>>, vector<2x1024xf32>
    tpu.vector_store %arg3[%c0_1, %c0_2], %0 {strides = array<i32>} : memref<2x1024xf32, #tpu.memory_space<vmem>>, vector<2x1024xf32>,
    return
  }
  func.func @transform_0(%arg0: i32, %arg1: i32) -> (i32, i32) {
    %c0_i32 = arith.constant 0 : i32
    return %arg0, %arg1 : i32, i32
  }
  func.func @transform_1(%arg0: i32, %arg1: i32) -> (i32, i32) {
    %c0_i32 = arith.constant 0 : i32
    return %arg0, %arg1 : i32, i32
  }
}

</mosaic_0001>

<bundles_post_ra>
// kernel: flatten.1
= control target key start
LH: loop header
LB: loop body
LE: loop exit
PB: predicated region body
PF: predicated region fallthrough
CT: control target
= control target key end

     0   :  { %s76_s0 = inlined_call_operand.vmem [shape: f32[2,1024], index: 0, kind: input, shape index: {}]   ;;  %s77_s1 = inlined_call_operand.hbm [shape: f32[2,1024], index: 1, kind: output, shape index: {}]  }
   0x1   :  { %v9_v0 = vld [vmem:[%s76_s0] sm:$0xff]  ;;  %v10_v1 = vld [vmem:[%s76_s0 + $0x8] sm:$0xff] }
   0x2   :  { %6 = vsyncpa [#allocation3], 0  ;;  %s20_s12 = sshll.u32 %s77_s1, 4  ;;  %11 = vst [vmem:[#allocation2] sm:$0xff] %v9_v0  ;;  %s56_s13 = smov [#allocation2]   ;;  %s21_s12 = int_to_ptr.hbm [resolvable:$true] %s20_s12 }
   0x3   :  { %s18_s14 = sshll.u32 %s56_s13, 4  ;;  %12 = vst [vmem:[#allocation2 + $0x8] sm:$0xff] %v10_v1  ;;  %s19_s14 = int_to_ptr.vmem [resolvable:$true] %s18_s14 }
   0x4   :  { %23 = dma.vmem_to_hbm [thread:$0]  %s19_s14, 256, %s21_s12, [#allocation3]  }
   0x5   :  { %54 = dma.done.wait [#allocation3], 256  }
   0x6   :  { %55 = vsyncadd [#allocation3], 4294967040 }
   0x7   :  { %28 = vsyncpa [#allocation3], 1 }

</bundles_post_ra>
